<compile_context>
chip_gen: v5e
topology: v5e:2x2
jax: 0.10.0
libtpu: 0.0.40
codegen_flags: <defaults>
</compile_context>

<pallas_src>
import jax
import jax.numpy as jnp
from jax.experimental import pallas as pl
from jax.experimental.pallas import tpu as pltpu


def _round_up(n, m):
    return ((n + m - 1) // m) * m


def _cdiv(a, b):
    return (a + b - 1) // b


def _select_batch_tiling(B, tile_b_max):
    """Pick (tile_b, B_pad): large tiles to amortize the ~0.35 us grid-step overhead,
    minimal dead padding, and >=2 grid steps for big batches so v7x's two
    TensorCores both get a share of the 'parallel' batch axis."""
    tile_cap = max(8, min(tile_b_max, B))
    n_steps = _cdiv(B, tile_cap)
    if n_steps == 1 and B >= 512:
        n_steps = 2                      # v7x megacore: one tile per TensorCore
    tile_b = _round_up(_cdiv(B, n_steps), 8)   # f32 inputs -> 8-sublane alignment
    B_pad = _round_up(B, tile_b)
    return tile_b, B_pad


def qvalue_kernel(s_ref, a_ref, w1s_ref, w1a_ref, w2_ref, b12_ref, w3_ref, b3_ref,
                  o_ref):
    # In-kernel f32 -> bf16 cast (VPU): kills the separate XLA concat/cast pass.
    s_bf = s_ref[...].astype(jnp.bfloat16)
    a_bf = a_ref[...].astype(jnp.bfloat16)
    b12 = b12_ref[...]                       # (2, hidden) f32: row 0 = b1, row 1 = b2

    # Layer 1: concat([s, a]) @ W1 computed as s @ W1s + a @ W1a (bf16 MXU, f32 acc).
    h1 = jnp.dot(s_bf, w1s_ref[...], preferred_element_type=jnp.float32)
    h1 = h1 + jnp.dot(a_bf, w1a_ref[...], preferred_element_type=jnp.float32)
    h1 = jnp.maximum(h1 + b12[0:1, :], 0.0)

    # Layer 2: bf16 MXU, f32 accumulation; bias-add / ReLU stay f32 (v5e-safe).
    h2 = jnp.dot(h1.astype(jnp.bfloat16), w2_ref[...],
                 preferred_element_type=jnp.float32)
    h2 = jnp.maximum(h2 + b12[1:2, :], 0.0)

    # Final (hidden -> 1) layer: VPU broadcast-mul + XLU lane reduce in f32.
    # No padded 128-wide MXU matmul; output block is a single lane column.
    q = jnp.sum(h2 * w3_ref[...], axis=-1, keepdims=True) + b3_ref[...]
    o_ref[...] = q.astype(o_ref.dtype)


def qvalue_nn_forward(s, a, packed, *, tile_b=2048):
    """s: (B, n_obs) f32, a: (B, n_acs) f32; packed: output of pack_params()."""
    B, n_obs = s.shape
    _, n_acs = a.shape

    tile, B_pad = _select_batch_tiling(B, tile_b)
    if B_pad != B:
        # Only remaining wrapper-side op (triggers only for non-aligned B);
        # padded rows are sliced off below.
        s = jnp.pad(s, ((0, B_pad - B), (0, 0)))
        a = jnp.pad(a, ((0, B_pad - B), (0, 0)))

    def resident(arr):
        # Whole array + constant index_map -> stays VMEM-resident across grid steps.
        return pl.BlockSpec(arr.shape, lambda i: (0, 0))

    out = pl.pallas_call(
        qvalue_kernel,
        out_shape=jax.ShapeDtypeStruct((B_pad, 1), jnp.float32),
        grid=(B_pad // tile,),
        in_specs=[
            pl.BlockSpec((tile, n_obs), lambda i: (i, 0)),   # s: tiled over batch
            pl.BlockSpec((tile, n_acs), lambda i: (i, 0)),   # a: tiled over batch
            resident(packed["w1s"]),
            resident(packed["w1a"]),
            resident(packed["w2"]),
            resident(packed["b12"]),
            resident(packed["w3"]),
            resident(packed["b3"]),
        ],
        out_specs=pl.BlockSpec((tile, 1), lambda i: (i, 0)),
        compiler_params=pltpu.CompilerParams(dimension_semantics=("parallel",)),
    )(s, a, packed["w1s"], packed["w1a"], packed["w2"], packed["b12"],
      packed["w3"], packed["b3"])

    return out if B_pad == B else out[:B]


def init_params(key, n_obs, n_acs, hidden=256):
    """Mirror PyTorch defaults (f32, (in, out) layout).

    nn.Linear default: U(-1/sqrt(fan_in), 1/sqrt(fan_in)) for weight and bias.
    Final layer: U(-0.003, 0.003) for weight and bias (as in QValueNN.__init__).
    """
    k = jax.random.split(key, 6)
    n_in = n_obs + n_acs

    def lin(kw, kb, fan_in, fan_out, bound):
        w = jax.random.uniform(kw, (fan_in, fan_out), jnp.float32, -bound, bound)
        b = jax.random.uniform(kb, (1, fan_out), jnp.float32, -bound, bound)
        return w, b

    w1, b1 = lin(k[0], k[1], n_in, hidden, 1.0 / n_in ** 0.5)
    w2, b2 = lin(k[2], k[3], hidden, hidden, 1.0 / hidden ** 0.5)
    w3, b3 = lin(k[4], k[5], hidden, 1, 0.003)
    return dict(w1=w1, b1=b1, w2=w2, b2=b2, w3=w3, b3=b3)


def pack_params(p, n_obs):
    """One-time host-side packing: bf16 MXU weights, W1 split along K into its
    state/action halves (so no runtime concat), fused (2, hidden) f32 bias block,
    final layer kept as a tiny f32 (1, hidden) row + (1, 1) scalar bias."""
    return dict(
        w1s=p["w1"][:n_obs].astype(jnp.bfloat16),      # (n_obs, hidden) bf16
        w1a=p["w1"][n_obs:].astype(jnp.bfloat16),      # (n_acs, hidden) bf16
        w2=p["w2"].astype(jnp.bfloat16),               # (hidden, hidden) bf16
        b12=jnp.concatenate([p["b1"], p["b2"]], 0),    # (2, hidden) f32
        w3=p["w3"].T,                                  # (1, hidden) f32
        b3=p["b3"],                                    # (1, 1) f32
    )


def qvalue_ref(s, a, p):
    """Pure-JAX reference with the kernel's numerics (bf16 MXU layers 1-2 with f32
    accumulation, f32 final layer)."""
    bf = jnp.bfloat16
    x = jnp.concatenate([s, a], axis=1).astype(bf)
    h1 = jnp.maximum(
        jnp.dot(x, p["w1"].astype(bf), preferred_element_type=jnp.float32) + p["b1"],
        0.0)
    h2 = jnp.maximum(
        jnp.dot(h1.astype(bf), p["w2"].astype(bf),
                preferred_element_type=jnp.float32) + p["b2"], 0.0)
    return jnp.dot(h2, p["w3"]) + p["b3"]


if __name__ == "__main__":
    # Humanoid-v2 PAAC setup: obs dim 376, action dim 17, hidden=256.
    n_obs, n_acs, hidden = 376, 17, 256

    key = jax.random.PRNGKey(0)
    kp, ks, ka = jax.random.split(key, 3)
    params = init_params(kp, n_obs, n_acs, hidden)
    packed = pack_params(params, n_obs)

    # B=8 is the shipped PAAC n_envs=8 config (single tile, no padding, no wrapper
    # ops); B=600 exercises the padded, 2-step "parallel" grid path.
    for B in (8, 600):
        kb_s, kb_a = jax.random.split(jax.random.fold_in(ks, B))
        s = jax.random.normal(kb_s, (B, n_obs), jnp.float32)
        a = jax.random.uniform(kb_a, (B, n_acs), jnp.float32, -0.4, 0.4)

        out = jax.block_until_ready(qvalue_nn_forward(s, a, packed))
        ref = qvalue_ref(s, a, params)
        assert out.shape == (B, 1), out.shape
        assert jnp.allclose(out, ref, atol=1e-3, rtol=1e-3), f"mismatch at B={B}"

    print("KERNEL_OK")
</pallas_src>

<mosaic_0001>
module attributes {stable_mosaic.version = 11 : i64} {
  func.func @qvalue_kernel(%arg0: i32, %arg1: memref<8x376xf32, #tpu.memory_space<vmem>>, %arg2: memref<8x17xf32, #tpu.memory_space<vmem>>, %arg3: memref<376x256xbf16, #tpu.memory_space<vmem>>, %arg4: memref<17x256xbf16, #tpu.memory_space<vmem>>, %arg5: memref<256x256xbf16, #tpu.memory_space<vmem>>, %arg6: memref<2x256xf32, #tpu.memory_space<vmem>>, %arg7: memref<1x256xf32, #tpu.memory_space<vmem>>, %arg8: memref<1x1xf32, #tpu.memory_space<vmem>>, %arg9: memref<8x1xf32, #tpu.memory_space<vmem>>) attributes {dimension_semantics = [#tpu.dimension_semantics<parallel>], iteration_bounds = array<i64: 1>, scalar_prefetch = 0 : i64, scratch_operands = 0 : i64, tpu.core_type = #tpu.core_type<tc>, window_params = [{transform_indices = @transform_0, window_bounds = array<i64: 8, 376>}, {transform_indices = @transform_1, window_bounds = array<i64: 8, 17>}, {pipeline_mode = #tpu.pipeline_mode<synchronous>, transform_indices = @transform_2, window_bounds = array<i64: 376, 256>}, {pipeline_mode = #tpu.pipeline_mode<synchronous>, transform_indices = @transform_3, window_bounds = array<i64: 17, 256>}, {pipeline_mode = #tpu.pipeline_mode<synchronous>, transform_indices = @transform_4, window_bounds = array<i64: 256, 256>}, {pipeline_mode = #tpu.pipeline_mode<synchronous>, transform_indices = @transform_5, window_bounds = array<i64: 2, 256>}, {pipeline_mode = #tpu.pipeline_mode<synchronous>, transform_indices = @transform_6, window_bounds = array<i64: 1, 256>}, {pipeline_mode = #tpu.pipeline_mode<synchronous>, transform_indices = @transform_7, window_bounds = array<i64: 1, 1>}, {transform_indices = @transform_8, window_bounds = array<i64: 8, 1>}]} {
    %c0 = arith.constant 0 : index
    %c0_0 = arith.constant 0 : index
    %0 = vector.load %arg1[%c0, %c0_0] : memref<8x376xf32, #tpu.memory_space<vmem>>, vector<8x376xf32>
    %1 = arith.truncf %0 : vector<8x376xf32> to vector<8x376xbf16>
    %c0_1 = arith.constant 0 : index
    %c0_2 = arith.constant 0 : index
    %2 = vector.load %arg2[%c0_1, %c0_2] : memref<8x17xf32, #tpu.memory_space<vmem>>, vector<8x17xf32>
    %3 = arith.truncf %2 : vector<8x17xf32> to vector<8x17xbf16>
    %c0_3 = arith.constant 0 : index
    %c0_4 = arith.constant 0 : index
    %4 = vector.load %arg6[%c0_3, %c0_4] : memref<2x256xf32, #tpu.memory_space<vmem>>, vector<2x256xf32>
    %c0_5 = arith.constant 0 : index
    %c0_6 = arith.constant 0 : index
    %5 = vector.load %arg3[%c0_5, %c0_6] : memref<376x256xbf16, #tpu.memory_space<vmem>>, vector<376x256xbf16>
    %cst = arith.constant dense<0.000000e+00> : vector<8x256xf32>
    %6 = tpu.matmul %1, %5, %cst {dimension_numbers = #tpu.dot_dimension_numbers<[1], [0], [0], [1], [0, 0, 1, 1], [], []>} : vector<8x376xbf16>, vector<376x256xbf16>, vector<8x256xf32> -> vector<8x256xf32>
    %c0_7 = arith.constant 0 : index
    %c0_8 = arith.constant 0 : index
    %7 = vector.load %arg4[%c0_7, %c0_8] : memref<17x256xbf16, #tpu.memory_space<vmem>>, vector<17x256xbf16>
    %cst_9 = arith.constant dense<0.000000e+00> : vector<8x256xf32>
    %8 = tpu.matmul %3, %7, %cst_9 {dimension_numbers = #tpu.dot_dimension_numbers<[1], [0], [0], [1], [0, 0, 1, 1], [], []>} : vector<8x17xbf16>, vector<17x256xbf16>, vector<8x256xf32> -> vector<8x256xf32>
    %9 = arith.addf %6, %8 : vector<8x256xf32>
    %10 = vector.extract_strided_slice %4 {offsets = [0, 0], sizes = [1, 256], strides = [1, 1]} : vector<2x256xf32> to vector<1x256xf32>
    %11 = vector.broadcast %10 : vector<1x256xf32> to vector<8x256xf32>
    %12 = arith.addf %9, %11 : vector<8x256xf32>
    %cst_10 = arith.constant 0.000000e+00 : f32
    %13 = vector.broadcast %cst_10 : f32 to vector<8x256xf32>
    %14 = arith.maximumf %12, %13 : vector<8x256xf32>
    %15 = arith.truncf %14 : vector<8x256xf32> to vector<8x256xbf16>
    %c0_11 = arith.constant 0 : index
    %c0_12 = arith.constant 0 : index
    %16 = vector.load %arg5[%c0_11, %c0_12] : memref<256x256xbf16, #tpu.memory_space<vmem>>, vector<256x256xbf16>
    %cst_13 = arith.constant dense<0.000000e+00> : vector<8x256xf32>
    %17 = tpu.matmul %15, %16, %cst_13 {dimension_numbers = #tpu.dot_dimension_numbers<[1], [0], [0], [1], [0, 0, 1, 1], [], []>} : vector<8x256xbf16>, vector<256x256xbf16>, vector<8x256xf32> -> vector<8x256xf32>
    %18 = vector.extract_strided_slice %4 {offsets = [1, 0], sizes = [1, 256], strides = [1, 1]} : vector<2x256xf32> to vector<1x256xf32>
    %19 = vector.broadcast %18 : vector<1x256xf32> to vector<8x256xf32>
    %20 = arith.addf %17, %19 : vector<8x256xf32>
    %cst_14 = arith.constant 0.000000e+00 : f32
    %21 = vector.broadcast %cst_14 : f32 to vector<8x256xf32>
    %22 = arith.maximumf %20, %21 : vector<8x256xf32>
    %c0_15 = arith.constant 0 : index
    %c0_16 = arith.constant 0 : index
    %23 = vector.load %arg7[%c0_15, %c0_16] : memref<1x256xf32, #tpu.memory_space<vmem>>, vector<1x256xf32>
    %24 = vector.broadcast %23 : vector<1x256xf32> to vector<8x256xf32>
    %25 = arith.mulf %22, %24 : vector<8x256xf32>
    %cst_17 = arith.constant dense<0.000000e+00> : vector<8xf32>
    %26 = vector.multi_reduction <add>, %25, %cst_17 [1] : vector<8x256xf32> to vector<8xf32>
    %27 = vector.shape_cast %26 : vector<8xf32> to vector<8x1xf32>
    %c0_18 = arith.constant 0 : index
    %c0_19 = arith.constant 0 : index
    %28 = vector.load %arg8[%c0_18, %c0_19] : memref<1x1xf32, #tpu.memory_space<vmem>>, vector<1x1xf32>
    %29 = vector.broadcast %28 : vector<1x1xf32> to vector<8x1xf32>
    %30 = arith.addf %27, %29 : vector<8x1xf32>
    %c0_20 = arith.constant 0 : index
    %c0_21 = arith.constant 0 : index
    %31 = vector.load %arg9[%c0_20, %c0_21] : memref<8x1xf32, #tpu.memory_space<vmem>>, vector<8x1xf32>
    tpu.vector_store %arg9[%c0_20, %c0_21], %30 {strides = array<i32>} : memref<8x1xf32, #tpu.memory_space<vmem>>, vector<8x1xf32>,
    return
  }
  func.func @transform_0(%arg0: i32) -> (i32, i32) {
    %c0_i32 = arith.constant 0 : i32
    %c0_i32_0 = arith.constant 0 : i32
    return %arg0, %c0_i32 : i32, i32
  }
  func.func @transform_1(%arg0: i32) -> (i32, i32) {
    %c0_i32 = arith.constant 0 : i32
    %c0_i32_0 = arith.constant 0 : i32
    return %arg0, %c0_i32 : i32, i32
  }
  func.func @transform_2(%arg0: i32) -> (i32, i32) {
    %c0_i32 = arith.constant 0 : i32
    %c0_i32_0 = arith.constant 0 : i32
    %c0_i32_1 = arith.constant 0 : i32
    return %c0_i32, %c0_i32_0 : i32, i32
  }
  func.func @transform_3(%arg0: i32) -> (i32, i32) {
    %c0_i32 = arith.constant 0 : i32
    %c0_i32_0 = arith.constant 0 : i32
    %c0_i32_1 = arith.constant 0 : i32
    return %c0_i32, %c0_i32_0 : i32, i32
  }
  func.func @transform_4(%arg0: i32) -> (i32, i32) {
    %c0_i32 = arith.constant 0 : i32
    %c0_i32_0 = arith.constant 0 : i32
    %c0_i32_1 = arith.constant 0 : i32
    return %c0_i32, %c0_i32_0 : i32, i32
  }
  func.func @transform_5(%arg0: i32) -> (i32, i32) {
    %c0_i32 = arith.constant 0 : i32
    %c0_i32_0 = arith.constant 0 : i32
    %c0_i32_1 = arith.constant 0 : i32
    return %c0_i32, %c0_i32_0 : i32, i32
  }
  func.func @transform_6(%arg0: i32) -> (i32, i32) {
    %c0_i32 = arith.constant 0 : i32
    %c0_i32_0 = arith.constant 0 : i32
    %c0_i32_1 = arith.constant 0 : i32
    return %c0_i32, %c0_i32_0 : i32, i32
  }
  func.func @transform_7(%arg0: i32) -> (i32, i32) {
    %c0_i32 = arith.constant 0 : i32
    %c0_i32_0 = arith.constant 0 : i32
    %c0_i32_1 = arith.constant 0 : i32
    return %c0_i32, %c0_i32_0 : i32, i32
  }
  func.func @transform_8(%arg0: i32) -> (i32, i32) {
    %c0_i32 = arith.constant 0 : i32
    %c0_i32_0 = arith.constant 0 : i32
    return %arg0, %c0_i32 : i32, i32
  }
}

</mosaic_0001>

<bundles_post_ra>
// kernel: tpu_custom_call.1
= control target key start
LH: loop header
LB: loop body
LE: loop exit
PB: predicated region body
PF: predicated region fallthrough
CT: control target
= control target key end

     0   :  { %s1476_s0 = inlined_call_operand.hbm [shape: f32[8,376], index: 0, kind: input, shape index: {}]   ;;  %s1477_s1 = inlined_call_operand.hbm [shape: f32[8,17], index: 1, kind: input, shape index: {}]   ;;  %s1478_s2 = inlined_call_operand.hbm [shape: bf16[376,256], index: 2, kind: input, shape index: {}]   ;;  %s1479_s3 = inlined_call_operand.hbm [shape: bf16[17,256], index: 3, kind: input, shape index: {}]   ;;  %s1480_s4 = inlined_call_operand.hbm [shape: bf16[256,256], index: 4, kind: input, shape index: {}]   ;;  %s1481_s5 = inlined_call_operand.vmem [shape: f32[2,256], index: 5, kind: input, shape index: {}]   ;;  %s1482_s6 = inlined_call_operand.vmem [shape: f32[1,256], index: 6, kind: input, shape index: {}]   ;;  %s1483_s7 = inlined_call_operand.<no memory space> [shape: f32[1,1], index: 7, kind: input, shape index: {}]   ;;  %s1484_s8 = inlined_call_operand.vmem [shape: f32[8,1], index: 8, kind: output, shape index: {}]  }
   0x1   :  { %v13_v0 = vstv %s1483_s7 }
   0x2   :  { %14 = vst [vmem:[#allocation2] sm:$0x1] %v13_v0 }
   0x3   :  { %15 = vsyncpa [#allocation4], 0 }
   0x4   :  { %16 = vsyncpa [#allocation6], 0  ;;  %s34_s9 = sshll.u32 %s1477_s1, 4  ;;  %s35_s9 = int_to_ptr.hbm [resolvable:$true] %s34_s9 }
   0x5   :  { %17 = vsyncpa [#allocation9], 0  ;;  %s1372_s10 = smov [#allocation5]   ;;  %s57_s14 = sshll.u32 %s1479_s3, 4  ;;  %s58_s14 = int_to_ptr.hbm [resolvable:$true] %s57_s14 }
   0x6   :  { %s36_s11 = sshll.u32 %s1372_s10, 4  ;;  %s1373_s15 = smov [#allocation8]   ;;  %s37_s11 = int_to_ptr.vmem [resolvable:$true] %s36_s11 }
   0x7   :  { %39 = dma.hbm_to_vmem [thread:$0]  %s35_s9, 128, %s37_s11, [#allocation6]  }
   0x8   :  { %s59_s7 = sshll.u32 %s1373_s15, 4  ;;  %s23_s18 = sshll.u32 %s1476_s0, 4  ;;  %s60_s7 = int_to_ptr.vmem [resolvable:$true] %s59_s7  ;;  %s24_s18 = int_to_ptr.hbm [resolvable:$true] %s23_s18 }
   0x9   :  { %s1374_s1 = smov 128   ;;  %s1375_s19 = smov 8  }
   0xa   :  { %65 = dma.hbm_to_vmem [thread:$0]  %s58_s14, 384, %s60_s7, [#allocation9], %s1374_s1, %s1374_s1, %s1375_s19  }
   0xb   :  { %s44_s22 = sshll.u32 %s1478_s2, 4  ;;  %s1376_s23 = smov [#allocation3]   ;;  %s45_s22 = int_to_ptr.hbm [resolvable:$true] %s44_s22 }
   0xc   :  { %s25_s24 = sshll.u32 %s1376_s23, 4  ;;  %s1377_s3 = smov [#allocation7]   ;;  %s26_s24 = int_to_ptr.vmem [resolvable:$true] %s25_s24 }
   0xd   :  { %28 = dma.hbm_to_vmem [thread:$0]  %s24_s18, 384, %s26_s24, [#allocation4]  }
   0xe   :  { %s46_s25 = sshll.u32 %s1377_s3, 4  ;;  %s70_s0 = sshll.u32 %s1480_s4, 4  ;;  %s47_s25 = int_to_ptr.vmem [resolvable:$true] %s46_s25  ;;  %s71_s0 = int_to_ptr.hbm [resolvable:$true] %s70_s0 }
   0xf   :  { %52 = dma.hbm_to_vmem [thread:$0]  %s45_s22, 6016, %s47_s25, [#allocation6], %s1374_s1, %s1374_s1, %s1375_s19  }
  0x10   :  { %s1378_s28 = smov [#allocation10]  }
  0x11   :  { %s72_s29 = sshll.u32 %s1378_s28, 4  ;;  %s73_s29 = int_to_ptr.vmem [resolvable:$true] %s72_s29 }
  0x12   :  { %78 = dma.hbm_to_vmem [thread:$0]  %s71_s0, 4096, %s73_s29, [#allocation9], %s1374_s1, %s1374_s1, %s1375_s19  }
  0x13   :  { %1366 = dma.done.wait [#allocation4], 384  }
  0x14   :  { %1367 = vsyncadd [#allocation4], 4294966912 }
  0x15   :  { %1368 = dma.done.wait [#allocation6], 6144  }
  0x16   :  { %1369 = vsyncadd [#allocation6], 4294961152 }
  0x17   :  { %1370 = dma.done.wait [#allocation9], 4480  }
  0x18   :  { %1371 = vsyncadd [#allocation9], 4294962816  ;;  %v901_v1 = vld [vmem:[#allocation7 + $0x70] sm:$0xf]  ;;  %v1172_v2 = vld [vmem:[#allocation7 + $0x74] sm:$0xf0] }
  0x19   :  { %v965_v3 = vld [vmem:[#allocation7 + $0xf0] sm:$0xf]  ;;  %v902_v4 = vor.u32 %v1172_v2, %v901_v1  ;;  %v1188_v5 = vld [vmem:[#allocation7 + $0xf4] sm:$0xf0]  ;;  %v893_v6 = vld [vmem:[#allocation7 + $0x60] sm:$0xf] }
  0x1a   :  { %v1170_v7 = vld [vmem:[#allocation7 + $0x64] sm:$0xf0]  ;;  %v966_v8 = vor.u32 %v1188_v5, %v965_v3  ;;  %v957_v9 = vld [vmem:[#allocation7 + $0xe0] sm:$0xf]  ;;  %vm184_vm0 = vcmask 1040384   ;;  %v1379_v20 = vmov 0  }
  0x1b   :  { %v1186_v10 = vld [vmem:[#allocation7 + $0xe4] sm:$0xf0]  ;;  %465 = vmatpush.bf16.msra.mxu2 %v902_v4  ;;  %v894_v11 = vor.u32 %v1170_v7, %v893_v6  ;;  %v885_v13 = vld [vmem:[#allocation7 + $0x50] sm:$0xf]  ;;  %v1168_v14 = vld [vmem:[#allocation7 + $0x54] sm:$0xf0] }
  0x1c   :  { %478 = vmatpush.bf16.msra.mxu3 %v966_v8  ;;  %v958_v12 = vor.u32 %v1186_v10, %v957_v9  ;;  %v164_v15 = vld [vmem:[#allocation8 + $0x10] sm:$0x11]  ;;  %v949_v16 = vld [vmem:[#allocation7 + $0xd0] sm:$0xf]  ;;  %v1184_v17 = vld [vmem:[#allocation7 + $0xd4] sm:$0xf0]  ;;  %v886_v23 = vor.u32 %v1168_v14, %v885_v13 }
  0x1d   :  { %v172_v18 = vunpack.c.l.b16 %v164_v15  ;;  %v173_v19 = vunpack.c.h.b16 %v164_v15  ;;  %v186_v21 = vsel %vm184_vm0, 65535, %v1379_v20  ;;  %v1443_v22 = vld [vmem:[#allocation7 + $0x170] sm:$0xff]  ;;  %v877_v26 = vld [vmem:[#allocation7 + $0x40] sm:$0xf]  ;;  %v950_v28 = vor.u32 %v1184_v17, %v949_v16  ;;  %v1166_v29 = vld [vmem:[#allocation7 + $0x44] sm:$0xf0] }
  0x1e   :  { %v358_v27 = vunpack.c.l.b16 %v1443_v22  ;;  %v835_v30 = vld [vmem:[#allocation8] sm:$0xf]  ;;  %v1204_v31 = vld [vmem:[#allocation8 + $0x4] sm:$0xf0]  ;;  %v1182_v35 = vld [vmem:[#allocation7 + $0xc4] sm:$0xf0]  ;;  %v878_v40 = vor.u32 %v1166_v29, %v877_v26 }
  0x1f   :  { %466 = vmatpush.bf16.msra.mxu2 %v894_v11  ;;  %v176_v24 = vpack.c.b16 %v172_v18, %v172_v18  ;;  %v177_v25 = vpack.c.b16 %v173_v19, %v173_v19  ;;  %v941_v34 = vld [vmem:[#allocation7 + $0xc0] sm:$0xf]  ;;  %vm458_vm1 = vcmask 1043456   ;;  %v1203_v37 = vld [vmem:[#allocation8 + $0x4] sm:$0xf]  ;;  %v836_v41 = vor.u32 %v1204_v31, %v835_v30 }
  0x20   :  { %479 = vmatpush.bf16.msra.mxu3 %v958_v12  ;;  %v406_v36 = vpack.c.b16 %v358_v27, %v358_v27  ;;  %v837_v38 = vld [vmem:[#allocation8 + $0x8] sm:$0xf0]  ;;  %v869_v39 = vld [vmem:[#allocation7 + $0x30] sm:$0xf]  ;;  %v1171_v42 = vld [vmem:[#allocation7 + $0x74] sm:$0xf]  ;;  %v942_v45 = vor.u32 %v1182_v35, %v941_v34  ;;  %v359_v11 = vunpack.c.h.b16 %v1443_v22 }
  0x21   :  { %v188_v32 = vand.u32 %v186_v21, %v176_v24  ;;  %v191_v33 = vand.u32 %v186_v21, %v177_v25  ;;  %v903_v43 = vld [vmem:[#allocation7 + $0x78] sm:$0xf0]  ;;  %v1164_v46 = vld [vmem:[#allocation7 + $0x34] sm:$0xf0]  ;;  %v933_v47 = vld [vmem:[#allocation7 + $0xb0] sm:$0xf]  ;;  %v840_v50 = vor.u32 %v1203_v37, %v837_v38 }
  0x22   :  { %v112_v44 = vld [vmem:[#allocation5] sm:$0xff]  ;;  %v460_v49 = vsel %vm458_vm1, %v406_v36, 0  ;;  %v1021_v51 = vld [vmem:[#allocation7 + $0x160] sm:$0xf]  ;;  %v1202_v52 = vld [vmem:[#allocation7 + $0x164] sm:$0xf0]  ;;  %v906_v53 = vor.u32 %v1171_v42, %v903_v43  ;;  %v870_v55 = vor.u32 %v1164_v46, %v869_v39  ;;  %v407_v25 = vpack.c.b16 %v359_v11, %v359_v11 }
  0x23   :  { %467 = vmatpush.bf16.msra.mxu2 %v886_v23  ;;  %199 = vmatpush.bf16.msra.mxu0 %v188_v32  ;;  %v1180_v48 = vld [vmem:[#allocation7 + $0xb4] sm:$0xf0]  ;;  %v113_v54 = vpack.c.bf16 %v112_v44, %v112_v44  ;;  %v1169_v56 = vld [vmem:[#allocation7 + $0x64] sm:$0xf]  ;;  %v895_v57 = vld [vmem:[#allocation7 + $0x68] sm:$0xf0]  ;;  %v1022_v59 = vor.u32 %v1202_v52, %v1021_v51 }
  0x24   :  { %480 = vmatpush.bf16.msra.mxu3 %v950_v28  ;;  %212 = vmatpush.bf16.msra.mxu1 %v191_v33  ;;  %vm180_vm2 = vcmask 138240   ;;  %v934_v58 = vor.u32 %v1180_v48, %v933_v47  ;;  %v861_v60 = vld [vmem:[#allocation7 + $0x20] sm:$0xf]  ;;  %v1162_v61 = vld [vmem:[#allocation7 + $0x24] sm:$0xf0]  ;;  %v898_v2 = vor.u32 %v1169_v56, %v895_v57  ;;  %v463_v37 = vsel %vm458_vm1, %v407_v25, 0 }
  0x25   :  { %v925_v62 = vld [vmem:[#allocation7 + $0xa0] sm:$0xf]  ;;  %v1178_v63 = vld [vmem:[#allocation7 + $0xa4] sm:$0xf0]  ;;  %v1013_v0 = vld [vmem:[#allocation7 + $0x150] sm:$0xf]  ;;  %v862_v3 = vor.u32 %v1162_v61, %v861_v60 }
  0x26   :  { %v1200_v1 = vld [vmem:[#allocation7 + $0x154] sm:$0xf0]  ;;  %v1167_v4 = vld [vmem:[#allocation7 + $0x54] sm:$0xf]  ;;  %v887_v5 = vld [vmem:[#allocation7 + $0x58] sm:$0xf0]  ;;  %v926_v6 = vor.u32 %v1178_v63, %v925_v62 }
  0x27   :  { %468 = vmatpush.bf16.msra.mxu2 %v878_v40  ;;  %200 = vmatpush.bf16.msra.mxu0 %v836_v41  ;;  %v1014_v7 = vor.u32 %v1200_v1, %v1013_v0  ;;  %v853_v8 = vld [vmem:[#allocation7 + $0x10] sm:$0xf]  ;;  %v1160_v9 = vld [vmem:[#allocation7 + $0x14] sm:$0xf0]  ;;  %v1005_v13 = vld [vmem:[#allocation7 + $0x140] sm:$0xf]  ;;  %v890_v15 = vor.u32 %v1167_v4, %v887_v5 }
  0x28   :  { %481 = vmatpush.bf16.msra.mxu3 %v942_v45  ;;  %213 = vmatpush.bf16.msra.mxu1 %v840_v50  ;;  %v917_v10 = vld [vmem:[#allocation7 + $0x90] sm:$0xf]  ;;  %v1176_v12 = vld [vmem:[#allocation7 + $0x94] sm:$0xf0]  ;;  %v1198_v14 = vld [vmem:[#allocation7 + $0x144] sm:$0xf0]  ;;  %v854_v16 = vor.u32 %v1160_v9, %v853_v8 }
  0x29   :  { %v1165_v17 = vld [vmem:[#allocation7 + $0x44] sm:$0xf]  ;;  %v879_v18 = vld [vmem:[#allocation7 + $0x48] sm:$0xf0]  ;;  %v918_v19 = vor.u32 %v1176_v12, %v917_v10  ;;  %v1006_v20 = vor.u32 %v1198_v14, %v1005_v13  ;;  %v845_v21 = vld [vmem:[#allocation7] sm:$0xf] }
  0x2a   :  { %841 = vmatmul.msk.bf16.vlgmr.msra.gmra.mxu0 %vm180_vm2, %v113_v54  ;;  %v1158_v23 = vld [vmem:[#allocation7 + $0x4] sm:$0xf0]  ;;  %v909_v24 = vld [vmem:[#allocation7 + $0x80] sm:$0xf]  ;;  %v1187_v26 = vld [vmem:[#allocation7 + $0xf4] sm:$0xf]  ;;  %v882_v28 = vor.u32 %v1165_v17, %v879_v18 }
  0x2b   :  { %491 = vmatpush.bf16.msrb.mxu0 %v460_v49  ;;  %469 = vmatpush.bf16.msra.mxu2 %v870_v55  ;;  %v1174_v22 = vld [vmem:[#allocation7 + $0x84] sm:$0xf0]  ;;  %v967_v27 = vld [vmem:[#allocation7 + $0xf8] sm:$0xf0]  ;;  %v997_v29 = vld [vmem:[#allocation7 + $0x130] sm:$0xf]  ;;  %v846_v31 = vor.u32 %v1158_v23, %v845_v21 }
  0x2c   :  { %504 = vmatpush.bf16.msrb.mxu1 %v906_v53  ;;  %482 = vmatpush.bf16.msra.mxu3 %v934_v58  ;;  %v1196_v30 = vld [vmem:[#allocation7 + $0x134] sm:$0xf0]  ;;  %v1163_v32 = vld [vmem:[#allocation7 + $0x34] sm:$0xf]  ;;  %v871_v33 = vld [vmem:[#allocation7 + $0x38] sm:$0xf0]  ;;  %v910_v35 = vor.u32 %v1174_v22, %v909_v24  ;;  %v970_v36 = vor.u32 %v1187_v26, %v967_v27 }
  0x2d   :  { %842 = vmatmul.msk.bf16.vlgmr.msra.gmra.mxu1 %vm180_vm2, %v113_v54  ;;  %v106_v34 = vld [vmem:[#allocation3] sm:$0xff]  ;;  %v107_v38 = vld [vmem:[#allocation3 + $0x8] sm:$0xff]  ;;  %v998_v39 = vor.u32 %v1196_v30, %v997_v29  ;;  %v874_v43 = vor.u32 %v1163_v32, %v871_v33  ;;  %v1183_v54 = vld [vmem:[#allocation7 + $0xd4] sm:$0xf]  ;;  %vm454_vm3 = vcmask 982016   ;;  %vm824_vm4 = vcmask 7168  }
  0x2e   :  { %v1185_v40 = vld [vmem:[#allocation7 + $0xe4] sm:$0xf]  ;;  %v959_v41 = vld [vmem:[#allocation7 + $0xe8] sm:$0xf0]  ;;  %v989_v45 = vld [vmem:[#allocation7 + $0x120] sm:$0xf]  ;;  %v1451_v47 = vpack.c.bf16 %v106_v34, %v106_v34  ;;  %v1453_v50 = vpack.c.bf16 %v107_v38, %v107_v38 }
  0x2f   :  { %492 = vmatpush.bf16.msrb.mxu0 %v1022_v59  ;;  %470 = vmatpush.bf16.msra.mxu2 %v862_v3  ;;  %v1201_v42 = vld [vmem:[#allocation7 + $0x164] sm:$0xf]  ;;  %v1023_v44 = vld [vmem:[#allocation7 + $0x168] sm:$0xf0]  ;;  %v1194_v46 = vld [vmem:[#allocation7 + $0x124] sm:$0xf0]  ;;  %v962_v51 = vor.u32 %v1185_v40, %v959_v41 }
  0x30   :  { %505 = vmatpush.bf16.msrb.mxu1 %v898_v2  ;;  %483 = vmatpush.bf16.msra.mxu3 %v926_v6  ;;  %v1161_v48 = vld [vmem:[#allocation7 + $0x24] sm:$0xf]  ;;  %v863_v49 = vld [vmem:[#allocation7 + $0x28] sm:$0xf0]  ;;  %v1026_v52 = vor.u32 %v1201_v42, %v1023_v44  ;;  %v990_v53 = vor.u32 %v1194_v46, %v989_v45  ;;  %v951_v55 = vld [vmem:[#allocation7 + $0xd8] sm:$0xf0] }
  0x31   :  { %v1199_v56 = vld [vmem:[#allocation7 + $0x154] sm:$0xf]  ;;  %v866_v57 = vor.u32 %v1161_v48, %v863_v49  ;;  %v1015_v58 = vld [vmem:[#allocation7 + $0x158] sm:$0xf0]  ;;  %v981_v59 = vld [vmem:[#allocation7 + $0x110] sm:$0xf]  ;;  %v954_v63 = vor.u32 %v1183_v54, %v951_v55 }
  0x32   :  { %v1192_v60 = vld [vmem:[#allocation7 + $0x114] sm:$0xf0]  ;;  %v1159_v61 = vld [vmem:[#allocation7 + $0x14] sm:$0xf]  ;;  %v855_v62 = vld [vmem:[#allocation7 + $0x18] sm:$0xf0]  ;;  %v1018_v1 = vor.u32 %v1199_v56, %v1015_v58 }
  0x33   :  { %493 = vmatpush.bf16.msrb.mxu0 %v1014_v7  ;;  %471 = vmatpush.bf16.msra.mxu2 %v854_v16  ;;  %v1181_v0 = vld [vmem:[#allocation7 + $0xc4] sm:$0xf]  ;;  %v982_v2 = vor.u32 %v1192_v60, %v981_v59  ;;  %v943_v3 = vld [vmem:[#allocation7 + $0xc8] sm:$0xf0]  ;;  %v858_v6 = vor.u32 %v1159_v61, %v855_v62  ;;  %v973_v7 = vld [vmem:[#allocation7 + $0x100] sm:$0xf] }
  0x34   :  { %506 = vmatpush.bf16.msrb.mxu1 %v890_v15  ;;  %484 = vmatpush.bf16.msra.mxu3 %v918_v19  ;;  %v1197_v4 = vld [vmem:[#allocation7 + $0x144] sm:$0xf]  ;;  %v1007_v5 = vld [vmem:[#allocation7 + $0x148] sm:$0xf0]  ;;  %v1190_v8 = vld [vmem:[#allocation7 + $0x104] sm:$0xf0]  ;;  %v946_v13 = vor.u32 %v1181_v0, %v943_v3 }
  0x35   :  { %v1157_v9 = vld [vmem:[#allocation7 + $0x4] sm:$0xf]  ;;  %v847_v10 = vld [vmem:[#allocation7 + $0x8] sm:$0xf0]  ;;  %v1087_v11 = vld [vmem:[#allocation10 + $0x70] sm:$0xf]  ;;  %v1010_v14 = vor.u32 %v1197_v4, %v1007_v5  ;;  %v974_v15 = vor.u32 %v1190_v8, %v973_v7 }
  0x36   :  { %v1220_v12 = vld [vmem:[#allocation10 + $0x74] sm:$0xf0]  ;;  %v1179_v16 = vld [vmem:[#allocation7 + $0xb4] sm:$0xf]  ;;  %v935_v17 = vld [vmem:[#allocation7 + $0xb8] sm:$0xf0]  ;;  %v850_v19 = vor.u32 %v1157_v9, %v847_v10 }
  0x37   :  { %494 = vmatpush.bf16.msrb.mxu0 %v1006_v20  ;;  %472 = vmatpush.bf16.msra.mxu2 %v846_v31  ;;  %v108_v18 = vld [vmem:[#allocation3 + $0x10] sm:$0xff]  ;;  %v999_v21 = vld [vmem:[#allocation7 + $0x138] sm:$0xf0]  ;;  %v1088_v23 = vor.u32 %v1220_v12, %v1087_v11  ;;  %v1218_v25 = vld [vmem:[#allocation10 + $0x64] sm:$0xf0]  ;;  %v938_v22 = vor.u32 %v1179_v16, %v935_v17 }
  0x38   :  { %507 = vmatpush.bf16.msrb.mxu1 %v882_v28  ;;  %485 = vmatpush.bf16.msra.mxu3 %v910_v35  ;;  %v1195_v20 = vld [vmem:[#allocation7 + $0x134] sm:$0xf]  ;;  %v1079_v24 = vld [vmem:[#allocation10 + $0x60] sm:$0xf]  ;;  %v111_v26 = vpack.c.bf16 %v108_v18, %v108_v18  ;;  %v1177_v28 = vld [vmem:[#allocation7 + $0xa4] sm:$0xf] }
  0x39   :  { %v1002_v27 = vor.u32 %v1195_v20, %v999_v21  ;;  %v927_v29 = vld [vmem:[#allocation7 + $0xa8] sm:$0xf0]  ;;  %v1193_v30 = vld [vmem:[#allocation7 + $0x124] sm:$0xf]  ;;  %v1080_v32 = vor.u32 %v1218_v25, %v1079_v24  ;;  %v1175_v35 = vld [vmem:[#allocation7 + $0x94] sm:$0xf] }
  0x3a   :  { %473 = vmatmul.bf16.vlgmr.msra.gmra.mxu2 %v1451_v47  ;;  %v991_v31 = vld [vmem:[#allocation7 + $0x128] sm:$0xf0]  ;;  %v930_v33 = vor.u32 %v1177_v28, %v927_v29  ;;  %v983_v38 = vld [vmem:[#allocation7 + $0x118] sm:$0xf0]  ;;  %v1173_v41 = vld [vmem:[#allocation7 + $0x84] sm:$0xf] }
  0x3b   :  { %517 = vmatpush.bf16.msrb.mxu2 %v970_v36  ;;  %495 = vmatpush.bf16.msrb.mxu0 %v998_v39  ;;  %v994_v34 = vor.u32 %v1193_v30, %v991_v31  ;;  %v919_v36 = vld [vmem:[#allocation7 + $0x98] sm:$0xf0]  ;;  %v911_v42 = vld [vmem:[#allocation7 + $0x88] sm:$0xf0]  ;;  %v1219_v45 = vld [vmem:[#allocation10 + $0x74] sm:$0xf] }
  0x3c   :  { %530 = vmatpush.bf16.msrb.mxu3 %v463_v37  ;;  %508 = vmatpush.bf16.msrb.mxu1 %v874_v43  ;;  %v1191_v37 = vld [vmem:[#allocation7 + $0x114] sm:$0xf]  ;;  %v922_v39 = vor.u32 %v1175_v35, %v919_v36  ;;  %v1189_v43 = vld [vmem:[#allocation7 + $0x104] sm:$0xf]  ;;  %v975_v44 = vld [vmem:[#allocation7 + $0x108] sm:$0xf0]  ;;  %v914_v48 = vor.u32 %v1173_v41, %v911_v42 }
  0x3d   :  { %486 = vmatmul.bf16.vlgmr.msra.gmra.mxu3 %v1453_v50  ;;  %v986_v40 = vor.u32 %v1191_v37, %v983_v38  ;;  %v1089_v46 = vld [vmem:[#allocation10 + $0x78] sm:$0xf0]  ;;  %v1071_v54 = vld [vmem:[#allocation10 + $0x50] sm:$0xf]  ;;  %v1216_v55 = vld [vmem:[#allocation10 + $0x54] sm:$0xf0] }
  0x3e   :  { %v1092_v49 = vor.u32 %v1219_v45, %v1089_v46  ;;  %v1215_v56 = vld [vmem:[#allocation10 + $0x54] sm:$0xf]  ;;  %v1073_v58 = vld [vmem:[#allocation10 + $0x58] sm:$0xf0]  ;;  %v1063_v59 = vld [vmem:[#allocation10 + $0x40] sm:$0xf] }
  0x3f   :  { %518 = vmatpush.bf16.msrb.mxu2 %v962_v51  ;;  %496 = vmatpush.bf16.msrb.mxu0 %v990_v53  ;;  %v1217_v51 = vld [vmem:[#allocation10 + $0x64] sm:$0xf]  ;;  %v1214_v60 = vld [vmem:[#allocation10 + $0x44] sm:$0xf0]  ;;  %v1076_v61 = vor.u32 %v1215_v56, %v1073_v58  ;;  %v1211_v3 = vld [vmem:[#allocation10 + $0x34] sm:$0xf] }
  0x40   :  { %531 = vmatpush.bf16.msrb.mxu3 %v1026_v52  ;;  %509 = vmatpush.bf16.msrb.mxu1 %v866_v57  ;;  %v1081_v52 = vld [vmem:[#allocation10 + $0x68] sm:$0xf0]  ;;  %v1072_v57 = vor.u32 %v1216_v55, %v1071_v54  ;;  %v1213_v62 = vld [vmem:[#allocation10 + $0x44] sm:$0xf]  ;;  %v1064_v0 = vor.u32 %v1214_v60, %v1063_v59  ;;  %v1057_v5 = vld [vmem:[#allocation10 + $0x38] sm:$0xf0] }
  0x41   :  { %v1084_v53 = vor.u32 %v1217_v51, %v1081_v52  ;;  %v1047_v7 = vld [vmem:[#allocation10 + $0x20] sm:$0xf]  ;;  %v1210_v8 = vld [vmem:[#allocation10 + $0x24] sm:$0xf0]  ;;  %v1209_v9 = vld [vmem:[#allocation10 + $0x24] sm:$0xf] }
  0x42   :  { %v1048_v10 = vor.u32 %v1210_v8, %v1047_v7  ;;  %v1049_v11 = vld [vmem:[#allocation10 + $0x28] sm:$0xf0]  ;;  %v1153_v17 = vld [vmem:[#allocation10 + $0xf8] sm:$0xf0]  ;;  %v1208_v20 = vld [vmem:[#allocation10 + $0x14] sm:$0xf0] }
  0x43   :  { %519 = vmatpush.bf16.msrb.mxu2 %v954_v63  ;;  %497 = vmatpush.bf16.msrb.mxu0 %v982_v2  ;;  %v1065_v63 = vld [vmem:[#allocation10 + $0x48] sm:$0xf0]  ;;  %v1212_v2 = vld [vmem:[#allocation10 + $0x34] sm:$0xf0]  ;;  %v1052_v12 = vor.u32 %v1209_v9, %v1049_v11  ;;  %v1207_v24 = vld [vmem:[#allocation10 + $0x14] sm:$0xf] }
  0x44   :  { %532 = vmatpush.bf16.msrb.mxu3 %v1018_v1  ;;  %510 = vmatpush.bf16.msrb.mxu1 %v858_v6  ;;  %v1068_v1 = vor.u32 %v1213_v62, %v1065_v63  ;;  %v1060_v6 = vor.u32 %v1211_v3, %v1057_v5  ;;  %v1041_v25 = vld [vmem:[#allocation10 + $0x18] sm:$0xf0]  ;;  %v1233_v29 = vld [vmem:[#allocation10 + $0xe4] sm:$0xf]  ;;  %v1145_v30 = vld [vmem:[#allocation10 + $0xe8] sm:$0xf0] }
  0x45   :  { %v1205_v35 = vld [vmem:[#allocation10 + $0x4] sm:$0xf]  ;;  %v1033_v37 = vld [vmem:[#allocation10 + $0x8] sm:$0xf0]  ;;  %v1231_v41 = vld [vmem:[#allocation10 + $0xd4] sm:$0xf] }
  0x46   :  { %v1036_v38 = vor.u32 %v1205_v35, %v1033_v37  ;;  %v1127_v45 = vld [vmem:[#allocation10 + $0xc0] sm:$0xf]  ;;  %v1230_v46 = vld [vmem:[#allocation10 + $0xc4] sm:$0xf0]  ;;  %v1129_v51 = vld [vmem:[#allocation10 + $0xc8] sm:$0xf0] }
  0x47   :  { %520 = vmatpush.bf16.msrb.mxu2 %v946_v13  ;;  %498 = vmatpush.bf16.msrb.mxu0 %v974_v15  ;;  %v1151_v13 = vld [vmem:[#allocation10 + $0xf0] sm:$0xf]  ;;  %v1235_v15 = vld [vmem:[#allocation10 + $0xf4] sm:$0xf]  ;;  %v1228_v54 = vld [vmem:[#allocation10 + $0xb4] sm:$0xf0] }
  0x48   :  { %533 = vmatpush.bf16.msrb.mxu3 %v1010_v14  ;;  %511 = vmatpush.bf16.msrb.mxu1 %v850_v19  ;;  %v1236_v14 = vld [vmem:[#allocation10 + $0xf4] sm:$0xf0]  ;;  %v1156_v18 = vor.u32 %v1235_v15, %v1153_v17  ;;  %v1039_v19 = vld [vmem:[#allocation10 + $0x10] sm:$0xf]  ;;  %v1227_v55 = vld [vmem:[#allocation10 + $0xb4] sm:$0xf] }
  0x49   :  { %v1152_v16 = vor.u32 %v1236_v14, %v1151_v13  ;;  %v1121_v56 = vld [vmem:[#allocation10 + $0xb8] sm:$0xf0]  ;;  %v1111_v60 = vld [vmem:[#allocation10 + $0xa0] sm:$0xf]  ;;  %v1225_v62 = vld [vmem:[#allocation10 + $0xa4] sm:$0xf] }
  0x4a   :  { %1027 = vmatmul.msk.bf16.vlgmr.msrb.gmra.mxu0 %vm454_vm3, %v111_v26  ;;  %v1124_v59 = vor.u32 %v1227_v55, %v1121_v56  ;;  %v1224_v3 = vld [vmem:[#allocation10 + $0x94] sm:$0xf0]  ;;  %v1105_v7 = vld [vmem:[#allocation10 + $0x98] sm:$0xf0]  ;;  %v1222_v13 = vld [vmem:[#allocation10 + $0x84] sm:$0xf0] }
  0x4b   :  { %754 = vmatpush.bf16.msra.mxu0 %v1088_v23  ;;  %521 = vmatpush.bf16.msrb.mxu2 %v938_v22  ;;  %v1040_v23 = vor.u32 %v1208_v20, %v1039_v19  ;;  %v1044_v22 = vor.u32 %v1207_v24, %v1041_v25  ;;  %v1221_v14 = vld [vmem:[#allocation10 + $0x84] sm:$0xf] }
  0x4c   :  { %534 = vmatpush.bf16.msrb.mxu3 %v1002_v27  ;;  %512 = vmatmul.bf16.vlgmr.msrb.gmra.mxu1 %v1451_v47  ;;  %v978_v47 = vor.u32 %v1189_v43, %v975_v44  ;;  %v1234_v27 = vld [vmem:[#allocation10 + $0xe4] sm:$0xf0]  ;;  %v1137_v43 = vld [vmem:[#allocation10 + $0xd8] sm:$0xf0] }
  0x4d   :  { %767 = vmatpush.bf16.msra.mxu1 %v1152_v16  ;;  %v1140_v44 = vor.u32 %v1231_v41, %v1137_v43  ;;  %v1097_v16 = vld [vmem:[#allocation10 + $0x88] sm:$0xf0] }
  0x4f   :  { %755 = vmatpush.bf16.msra.mxu0 %v1080_v32  ;;  %522 = vmatpush.bf16.msrb.mxu2 %v930_v33  ;;  %v1148_v32 = vor.u32 %v1233_v29, %v1145_v30  ;;  %v1031_v33 = vld [vmem:[#allocation10] sm:$0xf] }
  0x50   :  { %535 = vmatpush.bf16.msrb.mxu3 %v994_v34  ;;  %v1206_v34 = vld [vmem:[#allocation10 + $0x4] sm:$0xf0] }
  0x51   :  { %v1032_v36 = vor.u32 %v1206_v34, %v1031_v33 }
  0x53   :  { %523 = vmatpush.bf16.msrb.mxu2 %v922_v39  ;;  %756 = vmatpush.bf16.msra.mxu0 %v1072_v57  ;;  %v1135_v39 = vld [vmem:[#allocation10 + $0xd0] sm:$0xf] }
  0x54   :  { %536 = vmatpush.bf16.msrb.mxu3 %v986_v40  ;;  %v1232_v40 = vld [vmem:[#allocation10 + $0xd4] sm:$0xf0] }
  0x55   :  { %v1136_v42 = vor.u32 %v1232_v40, %v1135_v39 }
  0x57   :  { %524 = vmatpush.bf16.msrb.mxu2 %v914_v48  ;;  %757 = vmatpush.bf16.msra.mxu0 %v1064_v0  ;;  %v1229_v48 = vld [vmem:[#allocation10 + $0xc4] sm:$0xf]  ;;  %v1113_v0 = vld [vmem:[#allocation10 + $0xa8] sm:$0xf0] }
  0x58   :  { %537 = vmatpush.bf16.msrb.mxu3 %v978_v47  ;;  %v1132_v52 = vor.u32 %v1229_v48, %v1129_v51 }
  0x5a   :  { %525 = vmatmul.bf16.vlgmr.msrb.gmra.mxu2 %v1453_v50  ;;  %v1055_v50 = vld [vmem:[#allocation10 + $0x30] sm:$0xf] }
  0x5b   :  { %780 = vmatpush.bf16.msra.mxu2 %v1092_v49  ;;  %1028 = vmatmul.msk.bf16.vlgmr.msrb.gmra.mxu3 %vm454_vm3, %v111_v26  ;;  %v1056_v4 = vor.u32 %v1212_v2, %v1055_v50  ;;  %v1143_v26 = vld [vmem:[#allocation10 + $0xe0] sm:$0xf]  ;;  %v1128_v49 = vor.u32 %v1230_v46, %v1127_v45  ;;  %v114_v50 = vld [vmem:[%s1481_s5] sm:$0xf] }
  0x5c   :  { %793 = vmatpush.bf16.msra.mxu3 %v1156_v18  ;;  %v1144_v28 = vor.u32 %v1234_v27, %v1143_v26  ;;  %v1103_v2 = vld [vmem:[#allocation10 + $0x90] sm:$0xf]  ;;  %v544_v11 = vperm.slane %v114_v50, 0  ;;  %v1100_v18 = vor.u32 %v1221_v14, %v1097_v16  ;;  %v545_v30 = vperm.slane %v114_v50, 2 }
  0x5d   :  { %758 = vmatpush.bf16.msra.mxu0 %v1056_v4  ;;  %v1104_v5 = vor.u32 %v1224_v3, %v1103_v2  ;;  %v588_v48 = vperm.slane %v114_v50, 1  ;;  %v1245_v2 = vld [vmem:[#allocation2] ss:$0 sm:$0xff] }
  0x5e   :  { %768 = vmatpush.bf16.msra.mxu1 %v1144_v28  ;;  %v548_v19 = vperm.slane %v544_v11, 0 }
  0x5f   :  { %781 = vmatpush.bf16.msra.mxu2 %v1084_v53  ;;  %v1119_v53 = vld [vmem:[#allocation10 + $0xb0] sm:$0xf] }
  0x60   :  { %794 = vmatpush.bf16.msra.mxu3 %v1148_v32  ;;  %v1120_v58 = vor.u32 %v1228_v54, %v1119_v53  ;;  %v808_v54 = vld [vmem:[%s1482_s6] sm:$0x3] }
  0x61   :  { %759 = vmatpush.bf16.msra.mxu0 %v1048_v10 }
  0x62   :  { %769 = vmatpush.bf16.msra.mxu1 %v1136_v42 }
  0x63   :  { %782 = vmatpush.bf16.msra.mxu2 %v1076_v61  ;;  %v1226_v61 = vld [vmem:[#allocation10 + $0xa4] sm:$0xf0] }
  0x64   :  { %795 = vmatpush.bf16.msra.mxu3 %v1140_v44  ;;  %v1112_v63 = vor.u32 %v1226_v61, %v1111_v60  ;;  %v811_v60 = vperm.slane %v808_v54, 1 }
  0x65   :  { %760 = vmatpush.bf16.msra.mxu0 %v1040_v23 }
  0x66   :  { %770 = vmatpush.bf16.msra.mxu1 %v1128_v49  ;;  %v589_v49 = vperm.slane %v114_v50, 3 }
  0x67   :  { %783 = vmatpush.bf16.msra.mxu2 %v1068_v1  ;;  %v1116_v1 = vor.u32 %v1225_v62, %v1113_v0 }
  0x68   :  { %796 = vmatpush.bf16.msra.mxu3 %v1132_v52  ;;  %v593_v52 = vperm.slane %v589_v49, 1 }
  0x69   :  { %761 = vmatpush.bf16.msra.mxu0 %v1032_v36  ;;  %v549_v36 = vperm.slane %v545_v30, 0 }
  0x6a   :  { %771 = vmatpush.bf16.msra.mxu1 %v1120_v58 }
  0x6b   :  { %784 = vmatpush.bf16.msra.mxu2 %v1060_v6  ;;  %v1223_v6 = vld [vmem:[#allocation10 + $0x94] sm:$0xf] }
  0x6c   :  { %797 = vmatpush.bf16.msra.mxu3 %v1124_v59  ;;  %v1108_v10 = vor.u32 %v1223_v6, %v1105_v7  ;;  %v810_v59 = vperm.slane %v808_v54, 0 }
  0x6e   :  { %772 = vmatpush.bf16.msra.mxu1 %v1112_v63 }
  0x6f   :  { %785 = vmatpush.bf16.msra.mxu2 %v1052_v12  ;;  %v1095_v12 = vld [vmem:[#allocation10 + $0x80] sm:$0xf] }
  0x70   :  { %798 = vmatpush.bf16.msra.mxu3 %v1116_v1  ;;  %v1096_v15 = vor.u32 %v1222_v13, %v1095_v12 }
  0x72   :  { %773 = vmatpush.bf16.msra.mxu1 %v1104_v5 }
  0x73   :  { %786 = vmatpush.bf16.msra.mxu2 %v1044_v22 }
  0x74   :  { %799 = vmatpush.bf16.msra.mxu3 %v1108_v10 }
  0x76   :  { %774 = vmatpush.bf16.msra.mxu1 %v1096_v15 }
  0x77   :  { %787 = vmatpush.bf16.msra.mxu2 %v1036_v38 }
  0x78   :  { %800 = vmatpush.bf16.msra.mxu3 %v1100_v18 }
  0xa7   :  { %v1461_v21 = vpop.f32.mrf.mxu0 }
  0xaa   :  { %v1463_v31 = vpop.f32.mrf.mxu1 }
  0xaf   :  { %v204_v47 = vpop.f32.mrf.mxu0 }
  0xb0   :  { %v592_v47 = vperm.slane %v588_v48, 1 }
  0xb2   :  { %v217_v57 = vpop.f32.mrf.mxu1 }
  0xbd   :  { %v474_v4 = vpop.f32.mrf.mxu2 }
  0xbe   :  { %v475_v8 = vadd.f32 %v474_v4, %v1461_v21 }
  0xc0   :  { %v487_v9 = vpop.f32.mrf.mxu3 }
  0xc1   :  { %v488_v17 = vadd.f32 %v487_v9, %v475_v8 }
  0xc5   :  { %v476_v23 = vpop.f32.mrf.mxu2 }
  0xc7   :  { %v500_v20 = vpop.f32.mrf.mxu0 }
  0xc8   :  { %v501_v24 = vadd.f32 %v500_v20, %v488_v17  ;;  %v489_v21 = vpop.f32.mrf.mxu3 }
  0xc9   :  { %v513_v25 = vpop.f32.mrf.mxu1 }
  0xca   :  { %v550_v22 = vadd.f32 %v548_v19, %v501_v24  ;;  %v514_v32 = vadd.f32 %v513_v25, %v1463_v31 }
  0xcc   :  { %v552_v26 = vmax.f32 %v550_v22, 0.0 }
  0xce   :  { %v554_v27 = vpack.c.bf16 %v552_v26, %v552_v26 }
  0xcf   :  { %v502_v28 = vpop.f32.mrf.mxu0 }
  0xd0   :  { %762 = vmatmul.bf16.vlgmr.msra.gmra.mxu0 %v554_v27  ;;  %788 = vmatmul.bf16.vlgmr.msra.gmra.mxu2 %v554_v27 }
  0xd1   :  { %v515_v29 = vpop.f32.mrf.mxu1 }
  0xdd   :  { %v526_v33 = vpop.f32.mrf.mxu2 }
  0xde   :  { %v527_v34 = vadd.f32 %v526_v33, %v514_v32  ;;  %v539_v35 = vpop.f32.mrf.mxu3 }
  0xe0   :  { %v540_v37 = vadd.f32 %v539_v35, %v527_v34 }
  0xe2   :  { %v551_v38 = vadd.f32 %v549_v36, %v540_v37 }
  0xe4   :  { %v553_v39 = vmax.f32 %v551_v38, 0.0 }
  0xe5   :  { %v528_v40 = vpop.f32.mrf.mxu2 }
  0xe6   :  { %v555_v41 = vpack.c.bf16 %v553_v39, %v553_v39  ;;  %v541_v42 = vpop.f32.mrf.mxu3 }
  0xe8   :  { %775 = vmatmul.bf16.vlgmr.msra.gmra.mxu1 %v555_v41  ;;  %801 = vmatmul.bf16.vlgmr.msra.gmra.mxu3 %v555_v41 }
 0x14d   :  { %v763_v43 = vpop.f32.mrf.mxu0 }
 0x14e   :  { %v764_v51 = vadd.f32 %v763_v43, %v592_v47 }
 0x153   :  { %v789_v44 = vpop.f32.mrf.mxu2 }
 0x154   :  { %v790_v55 = vadd.f32 %v789_v44, %v593_v52 }
 0x155   :  { %v765_v45 = vpop.f32.mrf.mxu0 }
 0x15b   :  { %v791_v46 = vpop.f32.mrf.mxu2 }
 0x165   :  { %v776_v31 = vpop.f32.mrf.mxu1 }
 0x166   :  { %v777_v53 = vadd.f32 %v776_v31, %v764_v51 }
 0x168   :  { %v806_v57 = vmax.f32 %v777_v53, 0.0 }
 0x16a   :  { %v814_v63 = vmul.f32 %v810_v59, %v806_v57 }
 0x16b   :  { %v802_v56 = vpop.f32.mrf.mxu3 }
 0x16c   :  { %v803_v58 = vadd.f32 %v802_v56, %v790_v55 }
 0x16d   :  { %v778_v61 = vpop.f32.mrf.mxu1 }
 0x16e   :  { %v807_v62 = vmax.f32 %v803_v58, 0.0 }
 0x170   :  { %v815_v0 = vmul.f32 %v811_v60, %v807_v62 }
 0x172   :  { %v816_v1 = vadd.f32 %v815_v0, %v814_v63 }
 0x173   :  { %v804_v50 = vpop.f32.mrf.mxu3 }
 0x174   :  { %817 = vadd.xlane.f32.xlu0 %v816_v1 }
 0x1e7   :  { %v818_v3 = vpop.xlane.xlu0 %817 }
 0x1e8   :  { %v823_v4 = vadd.f32 %v1245_v2, %v818_v3 }
 0x1ea   :  { %825 = vst.msk [vmem:[%s1484_s8] sm:$0xff] %vm824_vm4, %v823_v4 }
 0x1eb   :  { %830 = vsyncpa [#allocation4], 1 }
 0x1ec   :  { %831 = vsyncpa [#allocation6], 1 }
 0x1ed   :  { %832 = vsyncpa [#allocation9], 1 }

</bundles_post_ra>
